<compile_context>
chip_gen: v6e
topology: v6e:2x2x1
jax: 0.10.0
libtpu: 0.0.40
codegen_flags: <defaults>
</compile_context>

<pallas_src>
import math

import jax
import jax.numpy as jnp
from jax.experimental import pallas as pl
from jax.experimental.pallas import tpu as pltpu


# -----------------------------------------------------------------------------
# Small helpers
# -----------------------------------------------------------------------------
def _round_up(x, m):
    return ((x + m - 1) // m) * m


def _pick_tile(dim, cap, align):
    """Largest align-multiple tile <= cap that divides dim; else the full dim.

    Only used for weight/model dims (E, 2E, 3E) which are well formed; the row
    dim of `linear` and the T axis of `attention` are padded instead.
    """
    if dim <= cap:
        return dim
    t = (cap // align) * align
    while t >= align:
        if dim % t == 0:
            return t
        t -= align
    return dim


def _compute_vmem_limit():
    # Generation-aware scoped-VMEM budget: ~3/4 of physical, capped at 100 MiB
    # (=> ~96 MiB on v5e/v6e's 128 MiB, ~48 MiB on v7x's 64 MiB).
    try:
        cap = int(pltpu.get_tpu_info().vmem_capacity_bytes)
    except Exception:  # e.g. CPU / interpret mode
        cap = 64 * 1024 * 1024
    return int(min((cap * 3) // 4, 100 * 1024 * 1024))


_VMEM_LIMIT_BYTES = _compute_vmem_limit()


# -----------------------------------------------------------------------------
# Kernel 1: tiled linear  y = x @ W_t + b   (W_t pre-transposed and bf16)
# -----------------------------------------------------------------------------
def _linear_kernel(x_ref, wt_ref, b_ref, o_ref, acc_ref):
    @pl.when(pl.program_id(2) == 0)
    def _init():
        acc_ref[...] = jnp.zeros_like(acc_ref)

    # bf16 MXU operands, f32 accumulation.
    acc_ref[...] += jnp.dot(
        x_ref[...].astype(jnp.bfloat16),
        wt_ref[...].astype(jnp.bfloat16),
        preferred_element_type=jnp.float32,
    )

    @pl.when(pl.program_id(2) == pl.num_programs(2) - 1)
    def _finalize():
        o_ref[...] = (acc_ref[...] + b_ref[...].astype(jnp.float32)).astype(o_ref.dtype)


def linear(x, wt, b2, *, out_dtype=None, tn_cap=256, tf_cap=512, tk_cap=512):
    """x: (N, K); wt: (K, F) bf16, pre-transposed; b2: (1, F) -> y: (N, F)."""
    N, K = x.shape
    F = wt.shape[1]
    out_dtype = x.dtype if out_dtype is None else out_dtype

    # Pad the (possibly ragged) row dim up to the tile instead of falling back
    # to a whole-array tile.
    tn = tn_cap if N >= tn_cap else _round_up(N, 8)
    n_pad = _round_up(N, tn)
    if n_pad != N:
        x = jnp.pad(x, ((0, n_pad - N), (0, 0)))

    tk = _pick_tile(K, tk_cap, 128)
    tf = _pick_tile(F, tf_cap, 128)
    grid = (n_pad // tn, F // tf, K // tk)

    y = pl.pallas_call(
        _linear_kernel,
        out_shape=jax.ShapeDtypeStruct((n_pad, F), out_dtype),
        grid=grid,
        in_specs=[
            pl.BlockSpec((tn, tk), lambda i, j, k: (i, k)),
            pl.BlockSpec((tk, tf), lambda i, j, k: (k, j)),
            pl.BlockSpec((1, tf), lambda i, j, k: (0, j)),
        ],
        out_specs=pl.BlockSpec((tn, tf), lambda i, j, k: (i, j)),
        scratch_shapes=[pltpu.VMEM((tn, tf), jnp.float32)],
        compiler_params=pltpu.CompilerParams(
            dimension_semantics=("parallel", "parallel", "arbitrary"),
            vmem_limit_bytes=_VMEM_LIMIT_BYTES,
        ),
    )(x, wt, b2)
    return y[:N] if n_pad != N else y


# -----------------------------------------------------------------------------
# Kernel 2: attention — one grid step = one (batch, T-tile), all heads inside.
#   q block (H, tq, D), k/v blocks (H, S, D) head-major (full last dim);
#   one lane-dense (tq, E) output store and one (tq, S) weights store per step.
# -----------------------------------------------------------------------------
def _make_attn_kernel(num_heads, with_mask):
    H = num_heads

    def kernel(*refs):
        if with_mask:
            q_ref, k_ref, v_ref, m_ref, o_ref, w_ref = refs
            m = m_ref[...].astype(jnp.float32)       # (tq, S), loaded once
        else:
            q_ref, k_ref, v_ref, o_ref, w_ref = refs

        outs = []
        w_acc = None
        # Python unroll is fine for small/typical H (feedback item 10).
        for h in range(H):
            qh = q_ref[h]                            # (tq, D) bf16, q pre-scaled
            kh = k_ref[h]                            # (S, D)  bf16
            vh = v_ref[h]                            # (S, D)  bf16

            s = jax.lax.dot_general(
                qh, kh, (((1,), (1,)), ((), ())),
                preferred_element_type=jnp.float32)  # (tq, S) f32
            if with_mask:
                s = s + m

            # Numerically-stable softmax; exact reciprocal because the
            # probabilities are also an exported module output.
            s = s - jnp.max(s, axis=-1, keepdims=True)
            e = jnp.exp(s)
            inv = pl.reciprocal(jnp.sum(e, axis=-1, keepdims=True), approx=False)
            p = e * inv                              # (tq, S) f32

            w_acc = p if w_acc is None else w_acc + p
            outs.append(jnp.dot(p.astype(jnp.bfloat16), vh,
                                preferred_element_type=jnp.float32))

        # Single lane-dense stores per grid step.
        o_ref[...] = jnp.concatenate(outs, axis=-1).astype(o_ref.dtype)
        w_ref[...] = (w_acc * (1.0 / H)).astype(w_ref.dtype)

    return kernel


def attention(qh, kh, vh, attn_mask, *, weights_dtype=jnp.float32, tq_cap=256):
    """qh: (B, H, T, D); kh/vh: (B, H, S, D); attn_mask: (T, S) or None.

    Returns (attn (B, T, E) bf16, attn_weights (B, T, S) weights_dtype)."""
    B, H, T, D = qh.shape
    S = kh.shape[2]
    E = H * D

    tq = tq_cap if T >= tq_cap else _round_up(T, 8)
    t_pad = _round_up(T, tq)
    if t_pad != T:
        qh = jnp.pad(qh, ((0, 0), (0, 0), (0, t_pad - T), (0, 0)))
        if attn_mask is not None:
            attn_mask = jnp.pad(attn_mask, ((0, t_pad - T), (0, 0)))

    with_mask = attn_mask is not None
    kernel = _make_attn_kernel(H, with_mask)
    grid = (B, t_pad // tq)

    def run(kv_buffer_count):
        kv_kwargs = {}
        if kv_buffer_count is not None:
            # KV block index only changes with b -> no need for deep buffering;
            # buffer_count=1 halves the largest VMEM resident (v7x: 64 MiB).
            kv_kwargs = dict(pipeline_mode=pl.Buffered(buffer_count=kv_buffer_count))
        in_specs = [
            pl.BlockSpec((None, H, tq, D), lambda b, t: (b, 0, t, 0)),
            pl.BlockSpec((None, H, S, D), lambda b, t: (b, 0, 0, 0), **kv_kwargs),
            pl.BlockSpec((None, H, S, D), lambda b, t: (b, 0, 0, 0), **kv_kwargs),
        ]
        args = [qh, kh, vh]
        if with_mask:
            in_specs.append(pl.BlockSpec((tq, S), lambda b, t: (t, 0)))
            args.append(attn_mask.astype(jnp.bfloat16))   # half the mask DMA bytes

        return pl.pallas_call(
            kernel,
            out_shape=(
                jax.ShapeDtypeStruct((B, t_pad, E), jnp.bfloat16),
                jax.ShapeDtypeStruct((B, t_pad, S), weights_dtype),
            ),
            grid=grid,
            in_specs=in_specs,
            out_specs=(
                pl.BlockSpec((None, tq, E), lambda b, t: (b, t, 0)),
                pl.BlockSpec((None, tq, S), lambda b, t: (b, t, 0)),
            ),
            compiler_params=pltpu.CompilerParams(
                dimension_semantics=("parallel", "parallel"),
                vmem_limit_bytes=_VMEM_LIMIT_BYTES,
            ),
        )(*args)

    try:
        o3, w3 = run(1)
    except Exception:
        # TODO(synk): this JAX build rejected Buffered(1); use default buffering.
        o3, w3 = run(None)

    if t_pad != T:
        o3 = o3[:, :T]
        w3 = w3[:, :T]
    return o3, w3


# -----------------------------------------------------------------------------
# Parameter preparation (once, outside the step): transpose weights, fold the
# 1/sqrt(head_dim) scaling into Wq/bq, fuse Q|K|V weights, pre-cast to bf16.
# -----------------------------------------------------------------------------
def prepare_params(params, num_heads):
    W = params["in_proj_weight"]                 # (3E, E); assumes input_dim == embed_dim
    bias = params["in_proj_bias"]                # (3E,)
    E = params["out_w"].shape[0]
    assert E % num_heads == 0
    D = E // num_heads
    scaling = D ** (-0.5)
    Wq, Wk, Wv = W[:E], W[E:2 * E], W[2 * E:]
    bq, bk, bv = bias[:E], bias[E:2 * E], bias[2 * E:]

    w_qkv_t = jnp.concatenate(
        [(Wq * scaling).T, Wk.T, Wv.T], axis=1).astype(jnp.bfloat16)     # (E, 3E)
    b_qkv = jnp.concatenate([bq * scaling, bk, bv]).reshape(1, 3 * E).astype(jnp.float32)

    return {
        "w_qkv_t": w_qkv_t,                      # fused self-attention projection
        "b_qkv": b_qkv,
        "wq_t": w_qkv_t[:, :E],                  # split (cross-attention) path
        "bq": b_qkv[:, :E],
        "wkv_t": w_qkv_t[:, E:],                 # fused K|V projection
        "bkv": b_qkv[:, E:],
        "wo_t": params["out_w"].T.astype(jnp.bfloat16),
        "bo": params["out_b"].reshape(1, E).astype(jnp.float32),
    }


# -----------------------------------------------------------------------------
# Full forward: SPMultiheadAttention(query, key, value, attn_mask, reverse=False)
# -----------------------------------------------------------------------------
def sp_multihead_attention(query, key, value, prepared, num_heads,
                           attn_mask=None, weights_dtype=jnp.float32):
    """query/key/value: (T, B, E) time-major. Returns (attn (T,B,E), attn_w (B,T,S))."""
    del value  # non-reverse path: k and v are both projected from `key`
    T, B, E = query.shape
    S = key.shape[0]
    H = num_heads
    D = E // H

    q_rows = jnp.transpose(query, (1, 0, 2)).reshape(B * T, E)

    if query is key:
        # Self-attention: single fused (E, 3E) projection over the same rows.
        qkv = linear(q_rows, prepared["w_qkv_t"], prepared["b_qkv"],
                     out_dtype=jnp.bfloat16)                           # (B*T, 3E)
        q2, k2, v2 = qkv[:, :E], qkv[:, E:2 * E], qkv[:, 2 * E:]
    else:
        k_rows = jnp.transpose(key, (1, 0, 2)).reshape(B * S, E)
        q2 = linear(q_rows, prepared["wq_t"], prepared["bq"],
                    out_dtype=jnp.bfloat16)                            # (B*T, E)
        kv2 = linear(k_rows, prepared["wkv_t"], prepared["bkv"],
                     out_dtype=jnp.bfloat16)                           # (B*S, 2E)
        k2, v2 = kv2[:, :E], kv2[:, E:]

    # Head-major layout so attention blocks have the full head dim as last dim.
    qh = jnp.transpose(q2.reshape(B, T, H, D), (0, 2, 1, 3))
    kh = jnp.transpose(k2.reshape(B, S, H, D), (0, 2, 1, 3))
    vh = jnp.transpose(v2.reshape(B, S, H, D), (0, 2, 1, 3))

    attn_o, attn_w = attention(qh, kh, vh, attn_mask,
                               weights_dtype=weights_dtype)            # (B,T,E), (B,T,S)

    out_rows = linear(attn_o.reshape(B * T, E), prepared["wo_t"], prepared["bo"],
                      out_dtype=query.dtype)
    out = jnp.transpose(out_rows.reshape(B, T, E), (1, 0, 2))          # (T, B, E)
    return out, attn_w


# -----------------------------------------------------------------------------
# SPF-style sparse mask (dense path) built in JAX.
# -----------------------------------------------------------------------------
def sparse_mask_jax(h, c, stride, pf, shift=0):
    rows = jnp.arange(h)
    mask = jnp.full((h, c), -jnp.inf, dtype=jnp.float32)
    for i in range(pf):
        cols = ((rows + 1) * stride - pf + i + shift) % c
        mask = mask.at[rows, cols].set(0.0)
    return mask


# -----------------------------------------------------------------------------
# Pure-JAX reference (mirrors the PyTorch forward) at HIGHEST matmul precision.
# -----------------------------------------------------------------------------
def reference(query, key, params, num_heads, attn_mask=None):
    hp = jax.lax.Precision.HIGHEST
    T, B, E = query.shape
    H = num_heads
    D = E // H
    W, bias = params["in_proj_weight"], params["in_proj_bias"]
    q = jnp.einsum("tbe,fe->tbf", query, W[:E], precision=hp) + bias[:E]
    k = jnp.einsum("sbe,fe->sbf", key, W[E:2 * E], precision=hp) + bias[E:2 * E]
    v = jnp.einsum("sbe,fe->sbf", key, W[2 * E:], precision=hp) + bias[2 * E:]
    q = q * (D ** (-0.5))
    q = q.reshape(T, B * H, D).transpose(1, 0, 2)
    k = k.reshape(-1, B * H, D).transpose(1, 0, 2)
    v = v.reshape(-1, B * H, D).transpose(1, 0, 2)
    S = k.shape[1]
    aw = jnp.einsum("ntd,nsd->nts", q, k, precision=hp)
    if attn_mask is not None:
        aw = aw + attn_mask[None]
    aw = jax.nn.softmax(aw, axis=-1)
    attn = jnp.einsum("nts,nsd->ntd", aw, v, precision=hp)
    attn = attn.transpose(1, 0, 2).reshape(T, B, E)
    attn = jnp.einsum("tbe,fe->tbf", attn, params["out_w"], precision=hp) + params["out_b"]
    aw = aw.reshape(B, H, T, S).sum(axis=1) / H
    return attn, aw


if __name__ == "__main__":
    # Small, module-consistent shapes: seq T=8, batch B=2, embed E=32, heads H=4.
    T, B, E, H = 8, 2, 32, 4
    S_CROSS = 16

    root = jax.random.PRNGKey(0)
    k_w_in, k_b_in, k_w_out, k_b_out, k_q, k_k = jax.random.split(root, 6)

    bound_in = math.sqrt(6.0 / (3 * E + E))
    bound_out = math.sqrt(6.0 / (E + E))
    params = {
        "in_proj_weight": jax.random.uniform(
            k_w_in, (3 * E, E), jnp.float32, -bound_in, bound_in),
        "in_proj_bias": 0.05 * jax.random.normal(k_b_in, (3 * E,), jnp.float32),
        "out_w": jax.random.uniform(
            k_w_out, (E, E), jnp.float32, -bound_out, bound_out),
        "out_b": 0.05 * jax.random.normal(k_b_out, (E,), jnp.float32),
    }

    query = jax.random.normal(k_q, (T, B, E), jnp.float32)
    x_cross = jax.random.normal(k_k, (S_CROSS, B, E), jnp.float32)

    prepared = prepare_params(params, H)

    # Tolerances sized for bf16 MXU operands (inputs are O(1) standard normal).
    ATOL_ATTN = 5e-2
    ATOL_W = 2e-2

    def check(attn, attn_w, ref_attn, ref_w, tag):
        attn = jax.block_until_ready(attn)
        attn_w = jax.block_until_ready(attn_w)
        err_a = float(jnp.max(jnp.abs(attn - ref_attn)))
        err_w = float(jnp.max(jnp.abs(attn_w - ref_w)))
        assert err_a < ATOL_ATTN, (tag, "attn", err_a)
        assert err_w < ATOL_W, (tag, "weights", err_w)

    # 1) self-attention, no mask (fused QKV projection + mask-free kernel).
    attn, attn_w = sp_multihead_attention(query, query, query, prepared, H)
    ref_attn, ref_w = reference(query, query, params, H)
    assert attn.shape == (T, B, E) and attn_w.shape == (B, T, T)
    check(attn, attn_w, ref_attn, ref_w, "self/no-mask")

    # 2) self-attention with an SPF-style sparse mask (masked kernel).
    mask = sparse_mask_jax(T, T, stride=1, pf=2, shift=0)
    attn_m, attn_w_m = sp_multihead_attention(
        query, query, query, prepared, H, attn_mask=mask)
    ref_attn_m, ref_w_m = reference(query, query, params, H, attn_mask=mask)
    check(attn_m, attn_w_m, ref_attn_m, ref_w_m, "self/sparse-mask")

    # 3) cross-attention with a longer source (split Q / fused-KV projections).
    attn_c, attn_w_c = sp_multihead_attention(query, x_cross, x_cross, prepared, H)
    ref_attn_c, ref_w_c = reference(query, x_cross, params, H)
    assert attn_c.shape == (T, B, E) and attn_w_c.shape == (B, T, S_CROSS)
    check(attn_c, attn_w_c, ref_attn_c, ref_w_c, "cross/no-mask")

    print("KERNEL_OK")
</pallas_src>

<mosaic_0001>
module attributes {stable_mosaic.version = 11 : i64} {
  func.func @_linear_kernel(%arg0: i32, %arg1: i32, %arg2: i32, %arg3: memref<16x32xf32, #tpu.memory_space<vmem>>, %arg4: memref<32x96xbf16, #tpu.memory_space<vmem>>, %arg5: memref<1x96xf32, #tpu.memory_space<vmem>>, %arg6: memref<16x96xbf16, #tpu.memory_space<vmem>>, %arg7: memref<16x96xf32, #tpu.memory_space<vmem>>) attributes {dimension_semantics = [#tpu.dimension_semantics<parallel>, #tpu.dimension_semantics<parallel>, #tpu.dimension_semantics<arbitrary>], iteration_bounds = array<i64: 1, 1, 1>, scalar_prefetch = 0 : i64, scratch_operands = 1 : i64, tpu.core_type = #tpu.core_type<tc>, window_params = [{transform_indices = @transform_0, window_bounds = array<i64: 16, 32>}, {transform_indices = @transform_1, window_bounds = array<i64: 32, 96>}, {transform_indices = @transform_2, window_bounds = array<i64: 1, 96>}, {transform_indices = @transform_3, window_bounds = array<i64: 16, 96>}]} {
    %c0_i32 = arith.constant 0 : i32
    %0 = arith.cmpi eq, %arg2, %c0_i32 : i32
    %1 = arith.extui %0 : i1 to i32
    %c0_i32_0 = arith.constant 0 : i32
    %2 = arith.cmpi ne, %1, %c0_i32_0 : i32
    scf.if %2 {
      %cst_10 = arith.constant 0.000000e+00 : f32
      %13 = vector.broadcast %cst_10 : f32 to vector<16x96xf32>
      %c0_11 = arith.constant 0 : index
      %c0_12 = arith.constant 0 : index
      %14 = vector.load %arg7[%c0_11, %c0_12] : memref<16x96xf32, #tpu.memory_space<vmem>>, vector<16x96xf32>
      tpu.vector_store %arg7[%c0_11, %c0_12], %13 {strides = array<i32>} : memref<16x96xf32, #tpu.memory_space<vmem>>, vector<16x96xf32>,
    } else {
    }
    %c0 = arith.constant 0 : index
    %c0_1 = arith.constant 0 : index
    %3 = vector.load %arg7[%c0, %c0_1] : memref<16x96xf32, #tpu.memory_space<vmem>>, vector<16x96xf32>
    %c0_2 = arith.constant 0 : index
    %c0_3 = arith.constant 0 : index
    %4 = vector.load %arg3[%c0_2, %c0_3] : memref<16x32xf32, #tpu.memory_space<vmem>>, vector<16x32xf32>
    %5 = arith.truncf %4 : vector<16x32xf32> to vector<16x32xbf16>
    %c0_4 = arith.constant 0 : index
    %c0_5 = arith.constant 0 : index
    %6 = vector.load %arg4[%c0_4, %c0_5] : memref<32x96xbf16, #tpu.memory_space<vmem>>, vector<32x96xbf16>
    %cst = arith.constant dense<0.000000e+00> : vector<16x96xf32>
    %7 = tpu.matmul %5, %6, %cst {dimension_numbers = #tpu.dot_dimension_numbers<[1], [0], [0], [1], [0, 0, 1, 1], [], []>} : vector<16x32xbf16>, vector<32x96xbf16>, vector<16x96xf32> -> vector<16x96xf32>
    %8 = arith.addf %3, %7 : vector<16x96xf32>
    %c0_6 = arith.constant 0 : index
    %c0_7 = arith.constant 0 : index
    %9 = vector.load %arg7[%c0_6, %c0_7] : memref<16x96xf32, #tpu.memory_space<vmem>>, vector<16x96xf32>
    tpu.vector_store %arg7[%c0_6, %c0_7], %8 {strides = array<i32>} : memref<16x96xf32, #tpu.memory_space<vmem>>, vector<16x96xf32>,
    %c0_i32_8 = arith.constant 0 : i32
    %10 = arith.cmpi eq, %arg2, %c0_i32_8 : i32
    %11 = arith.extui %10 : i1 to i32
    %c0_i32_9 = arith.constant 0 : i32
    %12 = arith.cmpi ne, %11, %c0_i32_9 : i32
    scf.if %12 {
      %c0_10 = arith.constant 0 : index
      %c0_11 = arith.constant 0 : index
      %13 = vector.load %arg7[%c0_10, %c0_11] : memref<16x96xf32, #tpu.memory_space<vmem>>, vector<16x96xf32>
      %c0_12 = arith.constant 0 : index
      %c0_13 = arith.constant 0 : index
      %14 = vector.load %arg5[%c0_12, %c0_13] : memref<1x96xf32, #tpu.memory_space<vmem>>, vector<1x96xf32>
      %15 = vector.broadcast %14 : vector<1x96xf32> to vector<16x96xf32>
      %16 = arith.addf %13, %15 : vector<16x96xf32>
      %17 = arith.truncf %16 : vector<16x96xf32> to vector<16x96xbf16>
      %c0_14 = arith.constant 0 : index
      %c0_15 = arith.constant 0 : index
      %18 = vector.load %arg6[%c0_14, %c0_15] : memref<16x96xbf16, #tpu.memory_space<vmem>>, vector<16x96xbf16>
      tpu.vector_store %arg6[%c0_14, %c0_15], %17 {strides = array<i32>} : memref<16x96xbf16, #tpu.memory_space<vmem>>, vector<16x96xbf16>,
    } else {
    }
    return
  }
  func.func @transform_0(%arg0: i32, %arg1: i32, %arg2: i32) -> (i32, i32) {
    %c0_i32 = arith.constant 0 : i32
    return %arg0, %arg2 : i32, i32
  }
  func.func @transform_1(%arg0: i32, %arg1: i32, %arg2: i32) -> (i32, i32) {
    %c0_i32 = arith.constant 0 : i32
    return %arg2, %arg1 : i32, i32
  }
  func.func @transform_2(%arg0: i32, %arg1: i32, %arg2: i32) -> (i32, i32) {
    %c0_i32 = arith.constant 0 : i32
    %c0_i32_0 = arith.constant 0 : i32
    return %c0_i32, %arg1 : i32, i32
  }
  func.func @transform_3(%arg0: i32, %arg1: i32, %arg2: i32) -> (i32, i32) {
    %c0_i32 = arith.constant 0 : i32
    return %arg0, %arg1 : i32, i32
  }
}

</mosaic_0001>

<bundles_post_ra>
// kernel: tpu_custom_call.1
= control target key start
LH: loop header
LB: loop body
LE: loop exit
PB: predicated region body
PF: predicated region fallthrough
CT: control target
= control target key end

     0   :  { %8 = vsyncpa [#allocation4], 0  ;;  %s312_s0 = inlined_call_operand.hbm [shape: f32[16,32], index: 0, kind: input, shape index: {}]   ;;  %s313_s1 = inlined_call_operand.hbm [shape: bf16[32,96], index: 1, kind: input, shape index: {}]   ;;  %s314_s2 = inlined_call_operand.vmem [shape: f32[1,96], index: 2, kind: input, shape index: {}]   ;;  %s315_s3 = inlined_call_operand.hbm [shape: bf16[16,96], index: 3, kind: output, shape index: {}]  }
   0x1   :  { %9 = vsyncpa [#allocation7], 0 }
   0x2   :  { %10 = vsyncpa [#allocation5], 0  ;;  %s261_s12 = smov [#allocation3]  }
   0x3   :  { %s16_s13 = sshll.u32 %s261_s12, 4  ;;  %s17_s13 = int_to_ptr.vmem [resolvable:$true] %s16_s13 }
   0x4   :  { %s203_s14 = scalar_lea.vmem %s17_s13, 256  ;;  %p208_p1 = scmp.lt.s32.totalorder %s17_s13, %s17_s13 }
   0x5   :  { %p204_p0 = scmp.ne.s32.totalorder %s17_s13, %s203_s14  ;;  %p209_p2 = scmp.lt.s32.totalorder %s203_s14, %s203_s14 }
   0x7   :  { %p210_p3 = por %p209_p2, %p208_p1 }
   0x9   :  { %p211_p4 = pnand %p210_p3, %p204_p0 }
   0xb   :  { %214 = shalt.err (!%p211_p4)
}
   0xc   :  { %s262_s15 = smov 128   ;;  %s263_s16 = smov 8  }
   0xd   :  { %22 = dma.hbm_to_vmem [thread:$0]  %s312_s0, 256, %s17_s13, [#allocation4], %s262_s15, %s262_s15, %s263_s16  }
   0xe   :  { %s264_s19 = smov [#allocation6]  }
   0xf   :  { %s28_s20 = sshll.u32 %s264_s19, 4  ;;  %s29_s20 = int_to_ptr.vmem [resolvable:$true] %s28_s20 }
  0x10   :  { %s223_s21 = scalar_lea.vmem %s29_s20, 256  ;;  %p228_p6 = scmp.lt.s32.totalorder %s29_s20, %s29_s20 }
  0x11   :  { %p224_p5 = scmp.ne.s32.totalorder %s29_s20, %s223_s21  ;;  %p229_p7 = scmp.lt.s32.totalorder %s223_s21, %s223_s21 }
  0x13   :  { %p230_p8 = por %p229_p7, %p228_p6 }
  0x15   :  { %p231_p9 = pnand %p230_p8, %p224_p5 }
  0x17   :  { %234 = shalt.err (!%p231_p9)
}
  0x18   :  { %s265_s22 = smov 64   ;;  %s266_s23 = smov 4  }
  0x19   :  { %34 = dma.hbm_to_vmem [thread:$0]  %s313_s1, 256, %s29_s20, [#allocation7], %s265_s22, %s265_s22, %s266_s23  }
  0x1a   :  { %255 = dma.done.wait [#allocation4], 256  }
  0x1b   :  { %256 = vsyncadd [#allocation4], 4294967040 }
  0x1c   :  { %257 = dma.done.wait [#allocation7], 256  }
  0x1d   :  { %258 = vsyncadd [#allocation7], 4294967040  ;;  %vm48_vm0 = vcmask 785408   ;;  %v267_v0 = vmov 0.0   ;;  %vm268_vm1 = vmmov 0   ;;  %v193_v1 = vld [vmem:[#allocation6 + $0x8] sm:$0xff]  }
  0x1e   :  { %49 = vst.msk [vmem:[#allocation2] sm:$0xff] %vm48_vm0, %v267_v0  ;;  %50 = vst.msk [vmem:[#allocation2 + $0x8] sm:$0xff] %vm48_vm0, %v267_v0  ;;  %176 = vmatprep.subr.bf16.mxu0 %v267_v0  ;;  %180 = vmatprep.mubr.msk.bf16.mxu0 %vm268_vm1, %v267_v0  ;;  %v194_v2 = vld [vmem:[#allocation6] sm:$0xff]   ;;  %v53_v3 = vld [vmem:[#allocation3] sm:$0xff]  ;;  %vm72_vm2 = vcmask 261120   ;;  %vm144_vm3 = vcmask 781312  }
  0x1f   :  { %177 = vmatpush3.bf16.msra.mxu0 %v193_v1  ;;  %v54_v4 = vld [vmem:[#allocation3 + $0x8] sm:$0xff]  ;;  %v168_v14 = vld [vmem:[%s314_s2] ss:$0 sm:$0xff]  ;;  %s269_s26 = smov [#allocation8]  }
  0x20   :  { %178 = vmatprep.subr.bf16.mxu0 %v267_v0  ;;  %v55_v5 = vpack.c.bf16 %v54_v4, %v53_v3  ;;  %s152_s27 = sshll.u32 %s269_s26, 4  ;;  %s153_s27 = int_to_ptr.vmem [resolvable:$true] %s152_s27 }
  0x21   :  { %s235_s28 = scalar_lea.vmem %s153_s27, 128  ;;  %p240_p11 = scmp.lt.s32.totalorder %s153_s27, %s153_s27 }
  0x22   :  { %p236_p10 = scmp.ne.s32.totalorder %s153_s27, %s235_s28  ;;  %p241_p12 = scmp.lt.s32.totalorder %s235_s28, %s235_s28 }
  0x23   :  { %179 = vmatpush3.bf16.msra.mxu0 %v194_v2 }
  0x24   :  { %p242_p13 = por %p241_p12, %p240_p11 }
  0x25   :  { %v51_v6 = vld [vmem:[#allocation2] sm:$0xff]  ;;  %v52_v10 = vld [vmem:[#allocation2 + $0x8] sm:$0xff] }
  0x26   :  { %181 = vmatmul.mubr.msk.bf16.vlgmr.msra.gmra.mxu0 %vm72_vm2, %v55_v5  ;;  %p243_p0 = pnand %p242_p13, %p236_p10 }
  0xe6   :  { %v110_v7 = vpop.f32.mrf.mxu0 }
  0xe7   :  { %v117_v8 = vadd.f32 %v110_v7, %v51_v6 }
  0xe8   :  { %v182_v9 = vpop.f32.mrf.mxu0 }
  0xe9   :  { %120 = vst.msk [vmem:[#allocation2] sm:$0xff] %vm48_vm0, %v117_v8 }
  0xea   :  { %v113_v11 = vpop.f32.mrf.mxu0 }
  0xeb   :  { %v118_v12 = vadd.f32 %v113_v11, %v52_v10 }
  0xec   :  { %v183_v13 = vpop.f32.mrf.mxu0 }
  0xed   :  { %121 = vst.msk [vmem:[#allocation2 + $0x8] sm:$0xff] %vm48_vm0, %v118_v12 }
  0xf0   :  { %v125_v15 = vld [vmem:[#allocation2] sm:$0xff] }
  0xf1   :  { %v134_v16 = vadd.f32 %v168_v14, %v125_v15 }
  0xf3   :  { %v171_v17 = vpack.c.bf16 %v134_v16, %v134_v16 }
  0xf4   :  { %v126_v18 = vld [vmem:[#allocation2 + $0x8] sm:$0xff] }
  0xf5   :  { %v135_v19 = vadd.f32 %v168_v14, %v126_v18  ;;  %145 = vst.msk [vmem:[#allocation8] sm:$0xf] %vm144_vm3, %v171_v17 }
  0xf7   :  { %v172_v20 = vpack.c.bf16 %v135_v19, %v135_v19 }
  0xf9   :  { %146 = vst.msk [vmem:[#allocation8 + $0x4] sm:$0xf] %vm144_vm3, %v172_v20 }
  0xfa   :  { %246 = shalt.err (!%p243_p0)
}
  0xfb   :  { %158 = dma.vmem_to_hbm [thread:$0]  %s153_s27, 128, %s315_s3, [#allocation5], %s265_s22, %s265_s22, %s266_s23  }
  0xfc   :  { %259 = dma.done.wait [#allocation5], 128  }
  0xfd   :  { %260 = vsyncadd [#allocation5], 4294967168 }
  0xfe   :  { %162 = vsyncpa [#allocation4], 1 }
  0xff   :  { %163 = vsyncpa [#allocation7], 1 }
 0x100   :  { %164 = vsyncpa [#allocation5], 1 }

</bundles_post_ra>
